<compile_context>
chip_gen: v7x
topology: tpu7x:2x2x1
jax: 0.10.0
libtpu: 0.0.40
codegen_flags: <defaults>
</compile_context>

<pallas_src>
import jax
import jax.numpy as jnp
from jax.experimental import pallas as pl
from jax.experimental.pallas import tpu as pltpu


def mlp_diff_kernel(x_ref, w_in_ref, b_in_ref, w_h_ref, b_h_ref,
                    w_out_ref, b_out_ref, sel_ref, o_ref):
    x = x_ref[...]  # (TB, D_in), compute dtype (bf16 or f32)

    # Residual x[:, :T] scattered into the first T of the 128 output lanes via a
    # 0/1 selector matmul (keeps the epilogue free of lane-shuffle ops).
    residual = jnp.dot(x, sel_ref[...], preferred_element_type=jnp.float32)

    # Input layer (no activation, matching the reference forward()).
    out = jnp.dot(x, w_in_ref[...], preferred_element_type=jnp.float32)
    out = out + b_in_ref[...]

    # Hidden layers: Linear -> ReLU. Static unroll (L is small & static).
    for l in range(w_h_ref.shape[0]):
        h = out.astype(w_h_ref.dtype)
        out = jnp.dot(h, w_h_ref[l], preferred_element_type=jnp.float32)
        out = jnp.maximum(out + b_h_ref[l], 0.0)

    # Output layer + residual; lane-dense (128-wide) unmasked store.
    y = jnp.dot(out.astype(w_out_ref.dtype), w_out_ref[...],
                preferred_element_type=jnp.float32)
    y = y + b_out_ref[...]
    o_ref[...] = (y + residual).astype(o_ref.dtype)


def _round_up(v, m):
    return ((v + m - 1) // m) * m


def mlp_relu_diff_dynamics(x, w_in, b_in, w_h, b_h, w_out, b_out,
                           *, block_b=512, use_bf16=True):
    """x: [B, input_dim] -> [B, target_dim].

    Weights are stored as [in_features, out_features] (transposed vs PyTorch's
    [out, in]); hidden weights/biases stacked along a leading layer axis.
    """
    B, D_in = x.shape
    H = w_in.shape[1]
    L = w_h.shape[0]
    T = w_out.shape[1]

    LANE = 128
    H_pad = _round_up(H, LANE)
    T_pad = _round_up(T, LANE)

    cdt = jnp.bfloat16 if use_bf16 else jnp.float32

    # Zero-pad hidden / output feature dims to full 128-lane width.
    # Zero rows/cols/biases keep the math exact (relu(0)=0 on padded lanes).
    w_in_p = jnp.pad(w_in, ((0, 0), (0, H_pad - H))).astype(cdt)
    b_in_p = jnp.pad(b_in, (0, H_pad - H)).astype(jnp.float32).reshape(1, H_pad)
    w_h_p = jnp.pad(w_h, ((0, 0), (0, H_pad - H), (0, H_pad - H))).astype(cdt)
    b_h_p = jnp.pad(b_h, ((0, 0), (0, H_pad - H))).astype(jnp.float32) \
               .reshape(L, 1, H_pad)
    w_out_p = jnp.pad(w_out, ((0, H_pad - H), (0, T_pad - T))).astype(cdt)
    b_out_p = jnp.pad(b_out, (0, T_pad - T)).astype(jnp.float32).reshape(1, T_pad)

    # Selector so x[:, :T] lands in lanes [0, T) of the padded output.
    col_mask = (jnp.arange(T_pad) < T).astype(jnp.float32)
    sel = (jnp.eye(D_in, T_pad, dtype=jnp.float32) * col_mask[None, :]).astype(cdt)

    # Batch tiling: TB a multiple of 8 sublanes; pad batch to whole tiles.
    TB = min(_round_up(B, 8), _round_up(block_b, 8))
    B_pad = _round_up(B, TB)
    x_p = jnp.pad(x, ((0, B_pad - B), (0, 0))).astype(cdt)
    grid = (B_pad // TB,)

    itemsize = jnp.dtype(cdt).itemsize
    flops = 2 * B_pad * (D_in * H_pad + L * H_pad * H_pad
                         + H_pad * T_pad + D_in * T_pad)
    bytes_accessed = (
        x_p.size * itemsize + B_pad * T_pad * 4
        + (w_in_p.size + w_h_p.size + w_out_p.size + sel.size) * itemsize
        + (b_in_p.size + b_h_p.size + b_out_p.size) * 4)

    out_p = pl.pallas_call(
        mlp_diff_kernel,
        out_shape=jax.ShapeDtypeStruct((B_pad, T_pad), jnp.float32),
        grid=grid,
        in_specs=[
            # x: tiled over batch, double-buffered by the pipeline.
            pl.BlockSpec((TB, D_in), lambda i: (i, 0)),
            # Weights / biases: full-shape blocks, constant index -> VMEM-resident.
            pl.BlockSpec((D_in, H_pad), lambda i: (0, 0)),
            pl.BlockSpec((1, H_pad), lambda i: (0, 0)),
            pl.BlockSpec((L, H_pad, H_pad), lambda i: (0, 0, 0)),
            pl.BlockSpec((L, 1, H_pad), lambda i: (0, 0, 0)),
            pl.BlockSpec((H_pad, T_pad), lambda i: (0, 0)),
            pl.BlockSpec((1, T_pad), lambda i: (0, 0)),
            pl.BlockSpec((D_in, T_pad), lambda i: (0, 0)),
        ],
        out_specs=pl.BlockSpec((TB, T_pad), lambda i: (i, 0)),
        compiler_params=pltpu.CompilerParams(
            dimension_semantics=("parallel",)),   # megacore sharding on v7x
        cost_estimate=pl.CostEstimate(
            flops=int(flops), transcendentals=0,
            bytes_accessed=int(bytes_accessed)),
    )(x_p, w_in_p, b_in_p, w_h_p, b_h_p, w_out_p, b_out_p, sel)

    # Strip batch padding and lane padding.
    return out_p[:B, :T].astype(x.dtype)


def reference(x, w_in, b_in, w_h, b_h, w_out, b_out):
    out = x @ w_in + b_in
    for l in range(w_h.shape[0]):
        out = jnp.maximum(out @ w_h[l] + b_h[l], 0.0)
    return out @ w_out + b_out + x[..., :w_out.shape[1]]


if __name__ == "__main__":
    # Small shapes consistent with the module.
    batch = 8
    input_dim = 16
    hidden_size = 32
    num_layers = 2
    target_dim = 8

    key = jax.random.PRNGKey(0)
    keys = jax.random.split(key, 8)

    # Deterministic parameter init (uniform, roughly PyTorch's default scale).
    def init(k, shape, fan_in):
        bound = 1.0 / jnp.sqrt(fan_in)
        return jax.random.uniform(k, shape, jnp.float32, -bound, bound)

    w_in = init(keys[1], (input_dim, hidden_size), input_dim)
    b_in = init(keys[2], (hidden_size,), input_dim)
    w_h = init(keys[3], (num_layers, hidden_size, hidden_size), hidden_size)
    b_h = init(keys[4], (num_layers, hidden_size), hidden_size)
    w_out = init(keys[5], (hidden_size, target_dim), hidden_size)
    b_out = init(keys[6], (target_dim,), hidden_size)

    # Test 1: tiny batch (single grid step).
    x = jax.random.normal(keys[0], (batch, input_dim), dtype=jnp.float32)
    out = mlp_relu_diff_dynamics(x, w_in, b_in, w_h, b_h, w_out, b_out)
    out = jax.block_until_ready(out)
    ref = reference(x, w_in, b_in, w_h, b_h, w_out, b_out)
    assert out.shape == (batch, target_dim)
    assert jnp.allclose(out, ref, atol=5e-2, rtol=5e-2)  # bf16 compute tolerance

    # Test 2: larger, non-divisible batch to exercise batch tiling + tail padding.
    x2 = jax.random.normal(keys[7], (300, input_dim), dtype=jnp.float32)
    out2 = mlp_relu_diff_dynamics(x2, w_in, b_in, w_h, b_h, w_out, b_out,
                                  block_b=128)
    out2 = jax.block_until_ready(out2)
    ref2 = reference(x2, w_in, b_in, w_h, b_h, w_out, b_out)
    assert out2.shape == (300, target_dim)
    assert jnp.allclose(out2, ref2, atol=5e-2, rtol=5e-2)

    print("KERNEL_OK")
</pallas_src>

<mosaic_0001>
module attributes {stable_mosaic.version = 11 : i64} {
  func.func @mlp_diff_kernel(%arg0: i32, %arg1: memref<8x16xbf16, #tpu.memory_space<vmem>>, %arg2: memref<16x128xbf16, #tpu.memory_space<vmem>>, %arg3: memref<1x128xf32, #tpu.memory_space<vmem>>, %arg4: memref<2x128x128xbf16, #tpu.memory_space<vmem>>, %arg5: memref<2x1x128xf32, #tpu.memory_space<vmem>>, %arg6: memref<128x128xbf16, #tpu.memory_space<vmem>>, %arg7: memref<1x128xf32, #tpu.memory_space<vmem>>, %arg8: memref<16x128xbf16, #tpu.memory_space<vmem>>, %arg9: memref<8x128xf32, #tpu.memory_space<vmem>>) attributes {dimension_semantics = [#tpu.dimension_semantics<parallel>], iteration_bounds = array<i64: 1>, scalar_prefetch = 0 : i64, scratch_operands = 0 : i64, tpu.core_type = #tpu.core_type<tc>, window_params = [{transform_indices = @transform_0, window_bounds = array<i64: 8, 16>}, {pipeline_mode = #tpu.pipeline_mode<synchronous>, transform_indices = @transform_1, window_bounds = array<i64: 16, 128>}, {pipeline_mode = #tpu.pipeline_mode<synchronous>, transform_indices = @transform_2, window_bounds = array<i64: 1, 128>}, {pipeline_mode = #tpu.pipeline_mode<synchronous>, transform_indices = @transform_3, window_bounds = array<i64: 2, 128, 128>}, {pipeline_mode = #tpu.pipeline_mode<synchronous>, transform_indices = @transform_4, window_bounds = array<i64: 2, 1, 128>}, {pipeline_mode = #tpu.pipeline_mode<synchronous>, transform_indices = @transform_5, window_bounds = array<i64: 128, 128>}, {pipeline_mode = #tpu.pipeline_mode<synchronous>, transform_indices = @transform_6, window_bounds = array<i64: 1, 128>}, {pipeline_mode = #tpu.pipeline_mode<synchronous>, transform_indices = @transform_7, window_bounds = array<i64: 16, 128>}, {transform_indices = @transform_8, window_bounds = array<i64: 8, 128>}]} {
    %c0 = arith.constant 0 : index
    %c0_0 = arith.constant 0 : index
    %0 = vector.load %arg1[%c0, %c0_0] : memref<8x16xbf16, #tpu.memory_space<vmem>>, vector<8x16xbf16>
    %c0_1 = arith.constant 0 : index
    %c0_2 = arith.constant 0 : index
    %1 = vector.load %arg8[%c0_1, %c0_2] : memref<16x128xbf16, #tpu.memory_space<vmem>>, vector<16x128xbf16>
    %cst = arith.constant dense<0.000000e+00> : vector<8x128xf32>
    %2 = tpu.matmul %0, %1, %cst {dimension_numbers = #tpu.dot_dimension_numbers<[1], [0], [0], [1], [0, 0, 1, 1], [], []>} : vector<8x16xbf16>, vector<16x128xbf16>, vector<8x128xf32> -> vector<8x128xf32>
    %c0_3 = arith.constant 0 : index
    %c0_4 = arith.constant 0 : index
    %3 = vector.load %arg2[%c0_3, %c0_4] : memref<16x128xbf16, #tpu.memory_space<vmem>>, vector<16x128xbf16>
    %cst_5 = arith.constant dense<0.000000e+00> : vector<8x128xf32>
    %4 = tpu.matmul %0, %3, %cst_5 {dimension_numbers = #tpu.dot_dimension_numbers<[1], [0], [0], [1], [0, 0, 1, 1], [], []>} : vector<8x16xbf16>, vector<16x128xbf16>, vector<8x128xf32> -> vector<8x128xf32>
    %c0_6 = arith.constant 0 : index
    %c0_7 = arith.constant 0 : index
    %5 = vector.load %arg3[%c0_6, %c0_7] : memref<1x128xf32, #tpu.memory_space<vmem>>, vector<1x128xf32>
    %6 = vector.broadcast %5 : vector<1x128xf32> to vector<8x128xf32>
    %7 = arith.addf %4, %6 : vector<8x128xf32>
    %8 = arith.truncf %7 : vector<8x128xf32> to vector<8x128xbf16>
    %c0_8 = arith.constant 0 : index
    %c0_9 = arith.constant 0 : index
    %c0_10 = arith.constant 0 : index
    %9 = vector.load %arg4[%c0_8, %c0_9, %c0_10] : memref<2x128x128xbf16, #tpu.memory_space<vmem>>, vector<1x128x128xbf16>
    %10 = vector.shape_cast %9 : vector<1x128x128xbf16> to vector<128x128xbf16>
    %cst_11 = arith.constant dense<0.000000e+00> : vector<8x128xf32>
    %11 = tpu.matmul %8, %10, %cst_11 {dimension_numbers = #tpu.dot_dimension_numbers<[1], [0], [0], [1], [0, 0, 1, 1], [], []>} : vector<8x128xbf16>, vector<128x128xbf16>, vector<8x128xf32> -> vector<8x128xf32>
    %c0_12 = arith.constant 0 : index
    %c0_13 = arith.constant 0 : index
    %c0_14 = arith.constant 0 : index
    %12 = vector.load %arg5[%c0_12, %c0_13, %c0_14] : memref<2x1x128xf32, #tpu.memory_space<vmem>>, vector<1x1x128xf32>
    %13 = vector.shape_cast %12 : vector<1x1x128xf32> to vector<1x128xf32>
    %14 = vector.broadcast %13 : vector<1x128xf32> to vector<8x128xf32>
    %15 = arith.addf %11, %14 : vector<8x128xf32>
    %cst_15 = arith.constant 0.000000e+00 : f32
    %16 = vector.broadcast %cst_15 : f32 to vector<8x128xf32>
    %17 = arith.maximumf %15, %16 : vector<8x128xf32>
    %18 = arith.truncf %17 : vector<8x128xf32> to vector<8x128xbf16>
    %c1 = arith.constant 1 : index
    %c0_16 = arith.constant 0 : index
    %c0_17 = arith.constant 0 : index
    %19 = vector.load %arg4[%c1, %c0_16, %c0_17] : memref<2x128x128xbf16, #tpu.memory_space<vmem>>, vector<1x128x128xbf16>
    %20 = vector.shape_cast %19 : vector<1x128x128xbf16> to vector<128x128xbf16>
    %cst_18 = arith.constant dense<0.000000e+00> : vector<8x128xf32>
    %21 = tpu.matmul %18, %20, %cst_18 {dimension_numbers = #tpu.dot_dimension_numbers<[1], [0], [0], [1], [0, 0, 1, 1], [], []>} : vector<8x128xbf16>, vector<128x128xbf16>, vector<8x128xf32> -> vector<8x128xf32>
    %c1_19 = arith.constant 1 : index
    %c0_20 = arith.constant 0 : index
    %c0_21 = arith.constant 0 : index
    %22 = vector.load %arg5[%c1_19, %c0_20, %c0_21] : memref<2x1x128xf32, #tpu.memory_space<vmem>>, vector<1x1x128xf32>
    %23 = vector.shape_cast %22 : vector<1x1x128xf32> to vector<1x128xf32>
    %24 = vector.broadcast %23 : vector<1x128xf32> to vector<8x128xf32>
    %25 = arith.addf %21, %24 : vector<8x128xf32>
    %cst_22 = arith.constant 0.000000e+00 : f32
    %26 = vector.broadcast %cst_22 : f32 to vector<8x128xf32>
    %27 = arith.maximumf %25, %26 : vector<8x128xf32>
    %28 = arith.truncf %27 : vector<8x128xf32> to vector<8x128xbf16>
    %c0_23 = arith.constant 0 : index
    %c0_24 = arith.constant 0 : index
    %29 = vector.load %arg6[%c0_23, %c0_24] : memref<128x128xbf16, #tpu.memory_space<vmem>>, vector<128x128xbf16>
    %cst_25 = arith.constant dense<0.000000e+00> : vector<8x128xf32>
    %30 = tpu.matmul %28, %29, %cst_25 {dimension_numbers = #tpu.dot_dimension_numbers<[1], [0], [0], [1], [0, 0, 1, 1], [], []>} : vector<8x128xbf16>, vector<128x128xbf16>, vector<8x128xf32> -> vector<8x128xf32>
    %c0_26 = arith.constant 0 : index
    %c0_27 = arith.constant 0 : index
    %31 = vector.load %arg7[%c0_26, %c0_27] : memref<1x128xf32, #tpu.memory_space<vmem>>, vector<1x128xf32>
    %32 = vector.broadcast %31 : vector<1x128xf32> to vector<8x128xf32>
    %33 = arith.addf %30, %32 : vector<8x128xf32>
    %34 = arith.addf %33, %2 : vector<8x128xf32>
    %c0_28 = arith.constant 0 : index
    %c0_29 = arith.constant 0 : index
    %35 = vector.load %arg9[%c0_28, %c0_29] : memref<8x128xf32, #tpu.memory_space<vmem>>, vector<8x128xf32>
    tpu.vector_store %arg9[%c0_28, %c0_29], %34 {strides = array<i32>} : memref<8x128xf32, #tpu.memory_space<vmem>>, vector<8x128xf32>,
    return
  }
  func.func @transform_0(%arg0: i32) -> (i32, i32) {
    %c0_i32 = arith.constant 0 : i32
    %c0_i32_0 = arith.constant 0 : i32
    return %arg0, %c0_i32 : i32, i32
  }
  func.func @transform_1(%arg0: i32) -> (i32, i32) {
    %c0_i32 = arith.constant 0 : i32
    %c0_i32_0 = arith.constant 0 : i32
    %c0_i32_1 = arith.constant 0 : i32
    return %c0_i32, %c0_i32_0 : i32, i32
  }
  func.func @transform_2(%arg0: i32) -> (i32, i32) {
    %c0_i32 = arith.constant 0 : i32
    %c0_i32_0 = arith.constant 0 : i32
    %c0_i32_1 = arith.constant 0 : i32
    return %c0_i32, %c0_i32_0 : i32, i32
  }
  func.func @transform_3(%arg0: i32) -> (i32, i32, i32) {
    %c0_i32 = arith.constant 0 : i32
    %c0_i32_0 = arith.constant 0 : i32
    %c0_i32_1 = arith.constant 0 : i32
    %c0_i32_2 = arith.constant 0 : i32
    return %c0_i32, %c0_i32_0, %c0_i32_1 : i32, i32, i32
  }
  func.func @transform_4(%arg0: i32) -> (i32, i32, i32) {
    %c0_i32 = arith.constant 0 : i32
    %c0_i32_0 = arith.constant 0 : i32
    %c0_i32_1 = arith.constant 0 : i32
    %c0_i32_2 = arith.constant 0 : i32
    return %c0_i32, %c0_i32_0, %c0_i32_1 : i32, i32, i32
  }
  func.func @transform_5(%arg0: i32) -> (i32, i32) {
    %c0_i32 = arith.constant 0 : i32
    %c0_i32_0 = arith.constant 0 : i32
    %c0_i32_1 = arith.constant 0 : i32
    return %c0_i32, %c0_i32_0 : i32, i32
  }
  func.func @transform_6(%arg0: i32) -> (i32, i32) {
    %c0_i32 = arith.constant 0 : i32
    %c0_i32_0 = arith.constant 0 : i32
    %c0_i32_1 = arith.constant 0 : i32
    return %c0_i32, %c0_i32_0 : i32, i32
  }
  func.func @transform_7(%arg0: i32) -> (i32, i32) {
    %c0_i32 = arith.constant 0 : i32
    %c0_i32_0 = arith.constant 0 : i32
    %c0_i32_1 = arith.constant 0 : i32
    return %c0_i32, %c0_i32_0 : i32, i32
  }
  func.func @transform_8(%arg0: i32) -> (i32, i32) {
    %c0_i32 = arith.constant 0 : i32
    %c0_i32_0 = arith.constant 0 : i32
    return %arg0, %c0_i32 : i32, i32
  }
}

</mosaic_0001>

<bundles_post_ra>
// kernel: tpu_custom_call.1
= control target key start
LH: loop header
LB: loop body
LE: loop exit
PB: predicated region body
PF: predicated region fallthrough
CT: control target
= control target key end

     0   :  { %13 = vsyncpa [#allocation3], 0  ;;  %s1016_s0 = inlined_call_operand.hbm [shape: bf16[8,16], index: 0, kind: input, shape index: {}]   ;;  %s1017_s1 = inlined_call_operand.hbm [shape: bf16[16,128], index: 1, kind: input, shape index: {}]   ;;  %s1018_s2 = inlined_call_operand.vmem [shape: f32[1,128], index: 2, kind: input, shape index: {}]   ;;  %s1019_s3 = inlined_call_operand.hbm [shape: bf16[2,128,128], index: 3, kind: input, shape index: {}]   ;;  %s1020_s4 = inlined_call_operand.vmem [shape: f32[2,1,128], index: 4, kind: input, shape index: {}]   ;;  %s1021_s5 = inlined_call_operand.hbm [shape: bf16[128,128], index: 5, kind: input, shape index: {}]   ;;  %s1022_s6 = inlined_call_operand.vmem [shape: f32[1,128], index: 6, kind: input, shape index: {}]   ;;  %s1023_s7 = inlined_call_operand.vmem [shape: bf16[16,128], index: 7, kind: input, shape index: {}]   ;;  %s1024_s8 = inlined_call_operand.hbm [shape: f32[8,128], index: 8, kind: output, shape index: {}]  }
   0x1   :  { %14 = vsyncpa [#allocation6], 0 }
   0x2   :  { %15 = vsyncpa [#allocation9], 0 }
   0x3   :  { %16 = vsyncpa [#allocation4], 0  ;;  %s842_s27 = smov [#allocation5]   ;;  %s724_s9 = scalar_lea.hbm %s1017_s1, 128 }
   0x4   :  { %s32_s28 = sshll.u32 %s842_s27, 4  ;;  %p725_p0 = scmp.ne.s32.totalorder %s1017_s1, %s724_s9  ;;  %s33_s28 = int_to_ptr.vmem [resolvable:$true] %s32_s28 }
   0x5   :  { %p728_p1 = scmp.lt.u32.totalorder %s724_s9, %s1017_s1 }
   0x7   :  { %p730_p2 = pnand %p728_p1, %p725_p0 }
   0x9   :  { %733 = shalt.err (!%p730_p2)
}
   0xa   :  { %s734_s14 = scalar_lea.vmem %s33_s28, 128  ;;  %p739_p4 = scmp.lt.s32.totalorder %s33_s28, %s33_s28 }
   0xb   :  { %p735_p3 = scmp.ne.s32.totalorder %s33_s28, %s734_s14  ;;  %p740_p5 = scmp.lt.s32.totalorder %s734_s14, %s734_s14 }
   0xd   :  { %p741_p6 = por %p740_p5, %p739_p4 }
   0xf   :  { %p742_p7 = pnand %p741_p6, %p735_p3 }
  0x11   :  { %745 = shalt.err (!%p742_p7)
}
  0x12   :  { %s843_s15 = smov 64   ;;  %s844_s16 = smov 4  }
  0x13   :  { %38 = dma.hbm_to_vmem [thread:$0]  %s1017_s1, 128, %s33_s28, [#allocation6], %s843_s15, %s843_s15, %s844_s16  }
  0x14   :  { %s845_s19 = smov [#allocation2]   ;;  %s846_s21 = smov [#allocation7]  }
  0x15   :  { %s23_s20 = sshll.u32 %s845_s19, 4  ;;  %s46_s22 = sshll.u32 %s846_s21, 4  ;;  %s24_s20 = int_to_ptr.vmem [resolvable:$true] %s23_s20  ;;  %s47_s22 = int_to_ptr.vmem [resolvable:$true] %s46_s22 }
  0x16   :  { %s746_s25 = scalar_lea.hbm %s1016_s0, 64 }
  0x17   :  { %p747_p8 = scmp.ne.s32.totalorder %s1016_s0, %s746_s25  ;;  %p750_p9 = scmp.lt.u32.totalorder %s746_s25, %s1016_s0 }
  0x19   :  { %p752_p10 = pnand %p750_p9, %p747_p8 }
  0x1b   :  { %755 = shalt.err (!%p752_p10)
}
  0x1c   :  { %s756_s1 = scalar_lea.vmem %s24_s20, 64  ;;  %p761_p12 = scmp.lt.s32.totalorder %s24_s20, %s24_s20 }
  0x1d   :  { %p757_p11 = scmp.ne.s32.totalorder %s24_s20, %s756_s1  ;;  %p762_p13 = scmp.lt.s32.totalorder %s756_s1, %s756_s1 }
  0x1f   :  { %p763_p0 = por %p762_p13, %p761_p12 }
  0x21   :  { %p764_p1 = pnand %p763_p0, %p757_p11 }
  0x23   :  { %767 = shalt.err (!%p764_p1)
}
  0x24   :  { %26 = dma.hbm_to_vmem [thread:$0]  %s1016_s0, 64, %s24_s20, [#allocation3]  }
  0x25   :  { %s768_s12 = scalar_lea.hbm %s1019_s3, 2048 }
  0x26   :  { %p769_p2 = scmp.ne.s32.totalorder %s1019_s3, %s768_s12  ;;  %p772_p3 = scmp.lt.u32.totalorder %s768_s12, %s1019_s3 }
  0x28   :  { %p774_p4 = pnand %p772_p3, %p769_p2 }
  0x2a   :  { %777 = shalt.err (!%p774_p4)
}
  0x2b   :  { %s778_s19 = scalar_lea.vmem %s47_s22, 2048  ;;  %p783_p6 = scmp.lt.s32.totalorder %s47_s22, %s47_s22 }
  0x2c   :  { %p779_p5 = scmp.ne.s32.totalorder %s47_s22, %s778_s19  ;;  %p784_p7 = scmp.lt.s32.totalorder %s778_s19, %s778_s19 }
  0x2e   :  { %p785_p8 = por %p784_p7, %p783_p6 }
  0x30   :  { %p786_p9 = pnand %p785_p8, %p779_p5 }
  0x32   :  { %789 = shalt.err (!%p786_p9)
}
  0x33   :  { %52 = dma.hbm_to_vmem [thread:$0]  %s1019_s3, 2048, %s47_s22, [#allocation6], %s843_s15, %s843_s15, %s844_s16  }
  0x34   :  { %s847_s21 = smov [#allocation8]   ;;  %s790_s26 = scalar_lea.hbm %s1021_s5, 1024 }
  0x35   :  { %s60_s23 = sshll.u32 %s847_s21, 4  ;;  %p791_p10 = scmp.ne.s32.totalorder %s1021_s5, %s790_s26  ;;  %s61_s23 = int_to_ptr.vmem [resolvable:$true] %s60_s23 }
  0x36   :  { %p794_p11 = scmp.lt.u32.totalorder %s790_s26, %s1021_s5 }
  0x38   :  { %p796_p12 = pnand %p794_p11, %p791_p10 }
  0x3a   :  { %799 = shalt.err (!%p796_p12)
}
  0x3b   :  { %s800_s28 = scalar_lea.vmem %s61_s23, 1024  ;;  %p805_p0 = scmp.lt.s32.totalorder %s61_s23, %s61_s23 }
  0x3c   :  { %p801_p13 = scmp.ne.s32.totalorder %s61_s23, %s800_s28  ;;  %p806_p1 = scmp.lt.s32.totalorder %s800_s28, %s800_s28 }
  0x3e   :  { %p807_p2 = por %p806_p1, %p805_p0 }
  0x40   :  { %p808_p3 = pnand %p807_p2, %p801_p13 }
  0x42   :  { %811 = shalt.err (!%p808_p3)
}
  0x43   :  { %66 = dma.hbm_to_vmem [thread:$0]  %s1021_s5, 1024, %s61_s23, [#allocation9], %s843_s15, %s843_s15, %s844_s16  }
  0x44   :  { %834 = dma.done.wait [#allocation3], 64  }
  0x45   :  { %835 = vsyncadd [#allocation3], 4294967232 }
  0x46   :  { %836 = dma.done.wait [#allocation6], 2176  }
  0x47   :  { %837 = vsyncadd [#allocation6], 4294965120 }
  0x48   :  { %838 = dma.done.wait [#allocation9], 1024  }
  0x49   :  { %839 = vsyncadd [#allocation9], 4294966272  ;;  %v848_v0 = vmov 0.0   ;;  %vm849_vm0 = vmmov 0   ;;  %v698_v1 = vld [vmem:[%s1023_s7] sm:$0xff]   ;;  %vm93_vm1 = vcmask 130048  }
  0x4a   :  { %615 = vmatprep.subr.bf16.mxu1 %v848_v0  ;;  %617 = vmatprep.mubr.msk.bf16.mxu1 %vm849_vm0, %v848_v0  ;;  %v84_v2 = vld [vmem:[#allocation2] sm:$0xf]  ;;  %v699_v3 = vld [vmem:[#allocation5] sm:$0xff]   ;;  %v700_v4 = vld [vmem:[#allocation7] sm:$0xff]   ;;  %s850_s14 = smov [#allocation10]  }
  0x4b   :  { %627 = vmatprep.subr.bf16.mxu0 %v848_v0  ;;  %643 = vmatprep.mubr.msk.bf16.mxu0 %vm849_vm0, %v848_v0  ;;  %v701_v5 = vld [vmem:[#allocation7 + $0x8] sm:$0xff]   ;;  %v702_v6 = vld [vmem:[#allocation7 + $0x10] sm:$0xff]   ;;  %v703_v7 = vld [vmem:[#allocation7 + $0x18] sm:$0xff]   ;;  %s540_s17 = sshll.u32 %s850_s14, 4  ;;  %s541_s17 = int_to_ptr.vmem [resolvable:$true] %s540_s17 }
  0x4c   :  { %616 = vmatpush3.bf16.msra.mxu1 %v698_v1  ;;  %628 = vmatpush3.bf16.msra.mxu0 %v700_v4  ;;  %v704_v8 = vld [vmem:[#allocation7 + $0x20] sm:$0xff]   ;;  %v705_v9 = vld [vmem:[#allocation7 + $0x28] sm:$0xff]   ;;  %v706_v10 = vld [vmem:[#allocation7 + $0x30] sm:$0xff]   ;;  %p817_p5 = scmp.lt.s32.totalorder %s541_s17, %s541_s17 }
  0x4d   :  { %621 = vmatprep.subr.bf16.mxu1 %v848_v0  ;;  %629 = vmatprep.subr.bf16.mxu0 %v848_v0  ;;  %v707_v11 = vld [vmem:[#allocation7 + $0x38] sm:$0xff]   ;;  %v708_v12 = vld [vmem:[#allocation7 + $0x40] sm:$0xff]   ;;  %v709_v13 = vld [vmem:[#allocation7 + $0x48] sm:$0xff]  }
  0x4e   :  { %v710_v14 = vld [vmem:[#allocation7 + $0x50] sm:$0xff]   ;;  %v711_v15 = vld [vmem:[#allocation7 + $0x58] sm:$0xff]   ;;  %v712_v16 = vld [vmem:[#allocation7 + $0x60] sm:$0xff]  }
  0x4f   :  { %618 = vmatmul.mubr.msk.bf16.vlgmr.msra.gmra.mrb[0].mxu1 %vm93_vm1, %v84_v2  ;;  %v713_v17 = vld [vmem:[#allocation7 + $0x68] sm:$0xff]   ;;  %v714_v29 = vld [vmem:[#allocation7 + $0x70] sm:$0xff]   ;;  %v715_v30 = vld [vmem:[#allocation7 + $0x78] sm:$0xff]  }
  0x50   :  { %622 = vmatpush3.bf16.msra.mxu1 %v699_v3  ;;  %623 = vmatprep.mubr.msk.bf16.mxu1 %vm849_vm0, %v848_v0  ;;  %v553_v22 = vld [vmem:[%s1018_s2] ss:$0 sm:$0xff]  ;;  %v716_v31 = vld [vmem:[#allocation8] sm:$0xff]   ;;  %v718_v33 = vld [vmem:[#allocation8 + $0x10] sm:$0xff]  }
  0x51   :  { %647 = vmatprep.subr.bf16.mxu1 %v848_v0  ;;  %630 = vmatpush3.bf16.msra.mxu0 %v701_v5  ;;  %v717_v32 = vld [vmem:[#allocation8 + $0x8] sm:$0xff]   ;;  %v719_v34 = vld [vmem:[#allocation8 + $0x18] sm:$0xff]   ;;  %v720_v35 = vld [vmem:[#allocation8 + $0x20] sm:$0xff]  }
  0x52   :  { %631 = vmatprep.subr.bf16.mxu0 %v848_v0  ;;  %v721_v36 = vld [vmem:[#allocation8 + $0x28] sm:$0xff]   ;;  %v722_v45 = vld [vmem:[#allocation8 + $0x30] sm:$0xff]   ;;  %v723_v46 = vld [vmem:[#allocation8 + $0x38] sm:$0xff]  }
  0x53   :  { %v556_v37 = vld [vmem:[%s1020_s4] ss:$0 sm:$0xff]  ;;  %v566_v47 = vld [vmem:[%s1020_s4 + $0x1] ss:$0 sm:$0xff]  ;;  %s812_s4 = scalar_lea.vmem %s541_s17, 128 }
  0x54   :  { %v575_v55 = vld [vmem:[%s1022_s6] ss:$0 sm:$0xff]  ;;  %p813_p4 = scmp.ne.s32.totalorder %s541_s17, %s812_s4  ;;  %p818_p6 = scmp.lt.s32.totalorder %s812_s4, %s812_s4 }
  0x55   :  { %632 = vmatpush3.bf16.msra.mxu0 %v702_v6 }
  0x56   :  { %633 = vmatprep.subr.bf16.mxu0 %v848_v0  ;;  %p819_p7 = por %p818_p6, %p817_p5 }
  0x57   :  { %624 = vmatmul.mubr.msk.bf16.vlgmr.msra.gmra.mrb[4].mxu1 %vm93_vm1, %v84_v2 }
  0x58   :  { %663 = vmatprep.mubr.msk.bf16.mxu1 %vm849_vm0, %v848_v0  ;;  %648 = vmatpush3.bf16.msra.mxu1 %v708_v12  ;;  %p820_p8 = pnand %p819_p7, %p813_p4 }
  0x59   :  { %634 = vmatpush3.bf16.msra.mxu0 %v703_v7  ;;  %649 = vmatprep.subr.bf16.mxu1 %v848_v0 }
  0x5a   :  { %635 = vmatprep.subr.bf16.mxu0 %v848_v0 }
  0x5c   :  { %650 = vmatpush3.bf16.msra.mxu1 %v709_v13 }
  0x5d   :  { %636 = vmatpush3.bf16.msra.mxu0 %v704_v8  ;;  %651 = vmatprep.subr.bf16.mxu1 %v848_v0 }
  0x5e   :  { %637 = vmatprep.subr.bf16.mxu0 %v848_v0 }
  0x60   :  { %652 = vmatpush3.bf16.msra.mxu1 %v710_v14 }
  0x61   :  { %638 = vmatpush3.bf16.msra.mxu0 %v705_v9  ;;  %653 = vmatprep.subr.bf16.mxu1 %v848_v0 }
  0x62   :  { %639 = vmatprep.subr.bf16.mxu0 %v848_v0 }
  0x64   :  { %654 = vmatpush3.bf16.msra.mxu1 %v711_v15 }
  0x65   :  { %640 = vmatpush3.bf16.msra.mxu0 %v706_v10  ;;  %655 = vmatprep.subr.bf16.mxu1 %v848_v0 }
  0x66   :  { %641 = vmatprep.subr.bf16.mxu0 %v848_v0 }
  0x68   :  { %656 = vmatpush3.bf16.msra.mxu1 %v712_v16 }
  0x69   :  { %642 = vmatpush3.bf16.msra.mxu0 %v707_v11  ;;  %657 = vmatprep.subr.bf16.mxu1 %v848_v0 }
  0x6a   :  { %667 = vmatprep.subr.bf16.mxu0 %v848_v0 }
  0x6c   :  { %658 = vmatpush3.bf16.msra.mxu1 %v713_v17 }
  0x6d   :  { %659 = vmatprep.subr.bf16.mxu1 %v848_v0 }
  0x70   :  { %660 = vmatpush3.bf16.msra.mxu1 %v714_v29 }
  0x71   :  { %661 = vmatprep.subr.bf16.mxu1 %v848_v0 }
  0x74   :  { %662 = vmatpush3.bf16.msra.mxu1 %v715_v30 }
 0x122   :  { %v131_v18 = vpop.f32.mrb[0].mxu1 }
 0x123   :  { %v619_v19 = vpop.f32.mrb[1].mxu1  ;;  %v687_v56 = vadd.f32 %v575_v55, %v131_v18 }
 0x124   :  { %v134_v20 = vpop.f32.mrb[2].mxu1 }
 0x125   :  { %v620_v21 = vpop.f32.mrb[3].mxu1 }
 0x12a   :  { %v186_v23 = vpop.f32.mrb[4].mxu1 }
 0x12b   :  { %v187_v24 = vadd.f32 %v553_v22, %v186_v23  ;;  %v625_v25 = vpop.f32.mrb[5].mxu1 }
 0x12c   :  { %v189_v26 = vpop.f32.mrb[6].mxu1 }
 0x12d   :  { %v192_v27 = vpack.c.bf16 %v187_v24, %v187_v24  ;;  %v626_v28 = vpop.f32.mrb[7].mxu1 }
 0x12f   :  { %644 = vmatmul.mubr.bf16.vlgmr.msra.gmra.mrb[0].mxu0 %v192_v27 }
 0x130   :  { %683 = vmatprep.mubr.msk.bf16.mxu0 %vm849_vm0, %v848_v0  ;;  %668 = vmatpush3.bf16.msra.mxu0 %v716_v31 }
 0x131   :  { %669 = vmatprep.subr.bf16.mxu0 %v848_v0 }
 0x134   :  { %670 = vmatpush3.bf16.msra.mxu0 %v717_v32 }
 0x135   :  { %671 = vmatprep.subr.bf16.mxu0 %v848_v0 }
 0x138   :  { %672 = vmatpush3.bf16.msra.mxu0 %v718_v33 }
 0x139   :  { %673 = vmatprep.subr.bf16.mxu0 %v848_v0 }
 0x13c   :  { %674 = vmatpush3.bf16.msra.mxu0 %v719_v34 }
 0x13d   :  { %675 = vmatprep.subr.bf16.mxu0 %v848_v0 }
 0x140   :  { %676 = vmatpush3.bf16.msra.mxu0 %v720_v35 }
 0x141   :  { %677 = vmatprep.subr.bf16.mxu0 %v848_v0 }
 0x144   :  { %678 = vmatpush3.bf16.msra.mxu0 %v721_v36 }
 0x145   :  { %679 = vmatprep.subr.bf16.mxu0 %v848_v0 }
 0x148   :  { %680 = vmatpush3.bf16.msra.mxu0 %v722_v45 }
 0x149   :  { %681 = vmatprep.subr.bf16.mxu0 %v848_v0 }
 0x14c   :  { %682 = vmatpush3.bf16.msra.mxu0 %v723_v46 }
 0x202   :  { %v298_v38 = vpop.f32.mrb[0].mxu0 }
 0x203   :  { %v299_v39 = vadd.f32 %v556_v37, %v298_v38  ;;  %v645_v40 = vpop.f32.mrb[1].mxu0 }
 0x204   :  { %v301_v41 = vpop.f32.mrb[2].mxu0 }
 0x205   :  { %v304_v42 = vmax.f32 %v299_v39, 0.0  ;;  %v646_v43 = vpop.f32.mrb[3].mxu0 }
 0x207   :  { %v305_v44 = vpack.c.bf16 %v304_v42, %v304_v42 }
 0x209   :  { %664 = vmatmul.mubr.bf16.vlgmr.msra.gmra.mrb[8].mxu1 %v305_v44 }
 0x2dc   :  { %v413_v48 = vpop.f32.mrb[8].mxu1 }
 0x2dd   :  { %v414_v49 = vadd.f32 %v566_v47, %v413_v48  ;;  %v665_v50 = vpop.f32.mrb[9].mxu1 }
 0x2de   :  { %v416_v51 = vpop.f32.mrb[10].mxu1 }
 0x2df   :  { %v419_v52 = vmax.f32 %v414_v49, 0.0  ;;  %v666_v53 = vpop.f32.mrb[11].mxu1 }
 0x2e1   :  { %v420_v54 = vpack.c.bf16 %v419_v52, %v419_v52 }
 0x2e3   :  { %684 = vmatmul.mubr.bf16.vlgmr.msra.gmra.mrb[4].mxu0 %v420_v54 }
 0x3b6   :  { %v526_v57 = vpop.f32.mrb[4].mxu0 }
 0x3b7   :  { %v688_v58 = vadd.f32 %v687_v56, %v526_v57  ;;  %v685_v59 = vpop.f32.mrb[5].mxu0 }
 0x3b8   :  { %v529_v60 = vpop.f32.mrb[6].mxu0 }
 0x3b9   :  { %533 = vst [vmem:[#allocation10] sm:$0xff] %v688_v58  ;;  %v686_v61 = vpop.f32.mrb[7].mxu0 }
 0x3ba   :  { %823 = shalt.err (!%p820_p8)
}
 0x3bb   :  { %s824_s6 = scalar_lea.hbm %s1024_s8, 128 }
 0x3bc   :  { %p825_p9 = scmp.ne.s32.totalorder %s1024_s8, %s824_s6  ;;  %p828_p10 = scmp.lt.u32.totalorder %s824_s6, %s1024_s8 }
 0x3be   :  { %p830_p11 = pnand %p828_p10, %p825_p9 }
 0x3c0   :  { %833 = shalt.err (!%p830_p11)
}
 0x3c1   :  { %543 = dma.vmem_to_hbm [thread:$0]  %s541_s17, 128, %s1024_s8, [#allocation4]  }
 0x3c2   :  { %840 = dma.done.wait [#allocation4], 128  }
 0x3c3   :  { %841 = vsyncadd [#allocation4], 4294967168 }
 0x3c4   :  { %547 = vsyncpa [#allocation3], 1 }
 0x3c5   :  { %548 = vsyncpa [#allocation6], 1 }
 0x3c6   :  { %549 = vsyncpa [#allocation9], 1 }
 0x3c7   :  { %550 = vsyncpa [#allocation4], 1 }

</bundles_post_ra>
